<compile_context>
chip_gen: v7x
topology: tpu7x:2x2x1
jax: 0.10.0
libtpu: 0.0.40
codegen_flags: <defaults>
</compile_context>

<pallas_src>
import functools

import jax
import jax.numpy as jnp
from jax.experimental import pallas as pl
from jax.experimental.pallas import tpu as pltpu


def _stop_control_kernel(x_ref, w_ref, b_ref, w_stop_ref, b_stop_ref, o_ref):
    # x_ref:      (TB, 2H)  fused [hidden_state, prev_hidden_state]
    # w_ref:      (2H, H)   fused [W_stop_s^T ; W_stop_s_1^T]
    # b_ref:      (1, H)    fused bias (b_s + b_s1)
    # w_stop_ref: (1, H)    output-head weight as a lane row (PyTorch layout, no transpose)
    # b_stop_ref: (1, 1)    scalar output bias in SMEM
    # o_ref:      (TB, 1)
    x = x_ref[...]

    # Single fused matmul on the MXU, f32 accumulation.
    t = jnp.tanh(
        jnp.dot(x, w_ref[...], preferred_element_type=jnp.float32) + b_ref[...]
    )  # (TB, H)

    # Output head: VPU multiply + XLU lane reduction instead of an N=1 MXU matmul.
    logits = jnp.sum(t * w_stop_ref[...], axis=-1, keepdims=True) + b_stop_ref[0, 0]

    o_ref[...] = jax.nn.sigmoid(logits)  # (TB, 1)


def prepare_stop_control_params(params):
    """One-time weight prep (call OUTSIDE the hot path).

    params: PyTorch-layout weights:
        W_stop_s_w  (H, H), W_stop_s_b  (H,)
        W_stop_s_1_w(H, H), W_stop_s_1_b(H,)
        W_stop_w    (1, H), W_stop_b    (1,)
    """
    w_fused = jnp.concatenate(
        [jnp.asarray(params["W_stop_s_w"], jnp.float32).T,
         jnp.asarray(params["W_stop_s_1_w"], jnp.float32).T],
        axis=0,
    )  # (2H, H)
    b_fused = (jnp.asarray(params["W_stop_s_b"], jnp.float32)
               + jnp.asarray(params["W_stop_s_1_b"], jnp.float32))[None, :]  # (1, H)
    w_stop = jnp.asarray(params["W_stop_w"], jnp.float32)                    # (1, H)
    b_stop = jnp.asarray(params["W_stop_b"], jnp.float32).reshape(1, 1)      # (1, 1)
    return w_fused, b_fused, w_stop, b_stop


@functools.partial(jax.jit, static_argnames=())
def stop_control(hidden_state, prev_hidden_state, w_fused, b_fused, w_stop, b_stop):
    """Pallas-backed StopControl.forward. Returns (B,) float32."""
    B, H = hidden_state.shape
    H2 = 2 * H

    # Per-call activation fusion (tiny: B x 2H), no per-call weight transposes.
    x = jnp.concatenate([hidden_state, prev_hidden_state], axis=-1)  # (B, 2H)

    # Batch tile: whole batch if small, 128-row tiles when B is a multiple of 128.
    tb = 128 if (B % 128 == 0) else B
    grid = (pl.cdiv(B, tb),)

    out = pl.pallas_call(
        _stop_control_kernel,
        out_shape=jax.ShapeDtypeStruct((B, 1), jnp.float32),
        grid=grid,
        in_specs=[
            pl.BlockSpec((tb, H2), lambda i: (i, 0)),   # fused activations
            pl.BlockSpec((H2, H), lambda i: (0, 0)),    # fused weight (resident)
            pl.BlockSpec((1, H), lambda i: (0, 0)),     # fused bias
            pl.BlockSpec((1, H), lambda i: (0, 0)),     # output-head weight row
            pl.BlockSpec(memory_space=pltpu.MemorySpace.SMEM),  # scalar bias
        ],
        out_specs=pl.BlockSpec((tb, 1), lambda i: (i, 0)),
        compiler_params=pltpu.CompilerParams(
            dimension_semantics=("parallel",),
        ),
    )(x, w_fused, b_fused, w_stop, b_stop)

    return out[:, 0]  # squeeze(-1)


def _init_params(key, hidden_size):
    """Deterministic synthetic init matching nn.Linear shapes (out, in)."""
    ks = jax.random.split(key, 6)
    H = hidden_size
    scale = 1.0 / jnp.sqrt(H)
    return {
        "W_stop_s_w":   jax.random.uniform(ks[0], (H, H), jnp.float32, -scale, scale),
        "W_stop_s_b":   jax.random.uniform(ks[1], (H,),   jnp.float32, -scale, scale),
        "W_stop_s_1_w": jax.random.uniform(ks[2], (H, H), jnp.float32, -scale, scale),
        "W_stop_s_1_b": jax.random.uniform(ks[3], (H,),   jnp.float32, -scale, scale),
        "W_stop_w":     jax.random.uniform(ks[4], (1, H), jnp.float32, -scale, scale),
        "W_stop_b":     jax.random.uniform(ks[5], (1,),   jnp.float32, -scale, scale),
    }


def _reference(hidden_state, prev_hidden_state, p):
    s = jnp.tanh(hidden_state @ p["W_stop_s_w"].T + p["W_stop_s_b"]
                 + prev_hidden_state @ p["W_stop_s_1_w"].T + p["W_stop_s_1_b"])
    logits = s @ p["W_stop_w"].T + p["W_stop_b"]
    return jax.nn.sigmoid(logits)[:, 0]


if __name__ == "__main__":
    key = jax.random.PRNGKey(0)
    B, H = 8, 32
    k_p, k_h, k_ph = jax.random.split(key, 3)

    params = _init_params(k_p, H)
    hidden_state = jax.random.normal(k_h, (B, H), jnp.float32)
    prev_hidden_state = jax.random.normal(k_ph, (B, H), jnp.float32)

    # One-time weight prep (hoisted out of the hot path).
    prepared = prepare_stop_control_params(params)

    out = stop_control(hidden_state, prev_hidden_state, *prepared)
    out = jax.block_until_ready(out)

    ref = _reference(hidden_state, prev_hidden_state, params)
    assert out.shape == (B,), out.shape
    assert jnp.allclose(out, ref, atol=1e-5, rtol=1e-5), (out, ref)

    print("KERNEL_OK")
</pallas_src>

<mosaic_0001>
module attributes {stable_mosaic.version = 11 : i64} {
  func.func @_stop_control_kernel(%arg0: i32, %arg1: memref<8x64xf32, #tpu.memory_space<vmem>>, %arg2: memref<64x32xf32, #tpu.memory_space<vmem>>, %arg3: memref<1x32xf32, #tpu.memory_space<vmem>>, %arg4: memref<1x32xf32, #tpu.memory_space<vmem>>, %arg5: memref<1x1xf32, #tpu.memory_space<smem>>, %arg6: memref<8x1xf32, #tpu.memory_space<vmem>>) attributes {dimension_semantics = [#tpu.dimension_semantics<parallel>], iteration_bounds = array<i64: 1>, scalar_prefetch = 0 : i64, scratch_operands = 0 : i64, tpu.core_type = #tpu.core_type<tc>, window_params = [{transform_indices = @transform_0, window_bounds = array<i64: 8, 64>}, {pipeline_mode = #tpu.pipeline_mode<synchronous>, transform_indices = @transform_1, window_bounds = array<i64: 64, 32>}, {pipeline_mode = #tpu.pipeline_mode<synchronous>, transform_indices = @transform_2, window_bounds = array<i64: 1, 32>}, {pipeline_mode = #tpu.pipeline_mode<synchronous>, transform_indices = @transform_3, window_bounds = array<i64: 1, 32>}, {transform_indices = @transform_4, window_bounds = array<i64: 1, 1>}, {transform_indices = @transform_5, window_bounds = array<i64: 8, 1>}]} {
    %c0 = arith.constant 0 : index
    %c0_0 = arith.constant 0 : index
    %0 = vector.load %arg1[%c0, %c0_0] : memref<8x64xf32, #tpu.memory_space<vmem>>, vector<8x64xf32>
    %c0_1 = arith.constant 0 : index
    %c0_2 = arith.constant 0 : index
    %1 = vector.load %arg2[%c0_1, %c0_2] : memref<64x32xf32, #tpu.memory_space<vmem>>, vector<64x32xf32>
    %cst = arith.constant dense<0.000000e+00> : vector<8x32xf32>
    %2 = tpu.matmul %0, %1, %cst {dimension_numbers = #tpu.dot_dimension_numbers<[1], [0], [0], [1], [0, 0, 1, 1], [], []>} : vector<8x64xf32>, vector<64x32xf32>, vector<8x32xf32> -> vector<8x32xf32>
    %c0_3 = arith.constant 0 : index
    %c0_4 = arith.constant 0 : index
    %3 = vector.load %arg3[%c0_3, %c0_4] : memref<1x32xf32, #tpu.memory_space<vmem>>, vector<1x32xf32>
    %4 = vector.broadcast %3 : vector<1x32xf32> to vector<8x32xf32>
    %5 = arith.addf %2, %4 : vector<8x32xf32>
    %6 = math.tanh %5 : vector<8x32xf32>
    %c0_5 = arith.constant 0 : index
    %c0_6 = arith.constant 0 : index
    %7 = vector.load %arg4[%c0_5, %c0_6] : memref<1x32xf32, #tpu.memory_space<vmem>>, vector<1x32xf32>
    %8 = vector.broadcast %7 : vector<1x32xf32> to vector<8x32xf32>
    %9 = arith.mulf %6, %8 : vector<8x32xf32>
    %cst_7 = arith.constant dense<0.000000e+00> : vector<8xf32>
    %10 = vector.multi_reduction <add>, %9, %cst_7 [1] : vector<8x32xf32> to vector<8xf32>
    %11 = vector.shape_cast %10 : vector<8xf32> to vector<8x1xf32>
    %c0_8 = arith.constant 0 : index
    %c0_9 = arith.constant 0 : index
    %12 = memref.load %arg5[%c0_8, %c0_9] : memref<1x1xf32, #tpu.memory_space<smem>>
    %13 = vector.broadcast %12 : f32 to vector<8x1xf32>
    %14 = arith.addf %11, %13 : vector<8x1xf32>
    %15 = arith.negf %14 : vector<8x1xf32>
    %16 = math.exp %15 : vector<8x1xf32>
    %cst_10 = arith.constant 1.000000e+00 : f32
    %17 = vector.broadcast %cst_10 : f32 to vector<8x1xf32>
    %18 = arith.addf %17, %16 : vector<8x1xf32>
    %19 = arith.divf %17, %18 : vector<8x1xf32>
    %c0_11 = arith.constant 0 : index
    %c0_12 = arith.constant 0 : index
    %20 = vector.load %arg6[%c0_11, %c0_12] : memref<8x1xf32, #tpu.memory_space<vmem>>, vector<8x1xf32>
    tpu.vector_store %arg6[%c0_11, %c0_12], %19 {strides = array<i32>} : memref<8x1xf32, #tpu.memory_space<vmem>>, vector<8x1xf32>,
    return
  }
  func.func @transform_0(%arg0: i32) -> (i32, i32) {
    %c0_i32 = arith.constant 0 : i32
    %c0_i32_0 = arith.constant 0 : i32
    return %arg0, %c0_i32 : i32, i32
  }
  func.func @transform_1(%arg0: i32) -> (i32, i32) {
    %c0_i32 = arith.constant 0 : i32
    %c0_i32_0 = arith.constant 0 : i32
    %c0_i32_1 = arith.constant 0 : i32
    return %c0_i32, %c0_i32_0 : i32, i32
  }
  func.func @transform_2(%arg0: i32) -> (i32, i32) {
    %c0_i32 = arith.constant 0 : i32
    %c0_i32_0 = arith.constant 0 : i32
    %c0_i32_1 = arith.constant 0 : i32
    return %c0_i32, %c0_i32_0 : i32, i32
  }
  func.func @transform_3(%arg0: i32) -> (i32, i32) {
    %c0_i32 = arith.constant 0 : i32
    %c0_i32_0 = arith.constant 0 : i32
    %c0_i32_1 = arith.constant 0 : i32
    return %c0_i32, %c0_i32_0 : i32, i32
  }
  func.func @transform_4(%arg0: i32) -> (i32, i32) {
    %c0_i32 = arith.constant 0 : i32
    %c0_i32_0 = arith.constant 0 : i32
    %c0_i32_1 = arith.constant 0 : i32
    return %c0_i32, %c0_i32_0 : i32, i32
  }
  func.func @transform_5(%arg0: i32) -> (i32, i32) {
    %c0_i32 = arith.constant 0 : i32
    %c0_i32_0 = arith.constant 0 : i32
    return %arg0, %c0_i32 : i32, i32
  }
}

</mosaic_0001>

<bundles_post_ra>
// kernel: stop_control.1
= control target key start
LH: loop header
LB: loop body
LE: loop exit
PB: predicated region body
PF: predicated region fallthrough
CT: control target
= control target key end

     0   :  { %v192_v0 = vmov 0.0|0.0   ;;  %vm193_vm0 = vmmov 0   ;;  %v194_v4 = vmov 0.0   ;;  %vm37_vm1 = vcmask 523264   ;;  %s264_s1 = inlined_call_operand.vmem [shape: f32[64,32], index: 1, kind: input, shape index: {}]   ;;  %s265_s0 = inlined_call_operand.vmem [shape: f32[8,64], index: 0, kind: input, shape index: {}]   ;;  %s266_s2 = inlined_call_operand.vmem [shape: f32[1,32], index: 2, kind: input, shape index: {}]   ;;  %s267_s3 = inlined_call_operand.vmem [shape: f32[1,32], index: 3, kind: input, shape index: {}]   ;;  %s268_s4 = inlined_call_operand.<no memory space> [shape: f32[1,1], index: 4, kind: input, shape index: {}]   ;;  %s269_s5 = inlined_call_operand.vmem [shape: f32[8,1], index: 5, kind: output, shape index: {}]  }
   0x1   :  { %171 = vmatprep.subr.bf16.mxu0 %v192_v0  ;;  %v22_v1 = vld [vmem:[%s264_s1] sm:$0xff]  ;;  %v23_v2 = vld [vmem:[%s264_s1 + $0x8] sm:$0xff]  ;;  %v24_v3 = vld [vmem:[%s264_s1 + $0x10] sm:$0xff]  ;;  %168 = vmatprep.mubr.msk.f32.mxu0 %vm193_vm0, %v194_v4  ;;  %vm120_vm2 = vcmask 261120   ;;  %v125_v23 = vstv %s268_s4  ;;  %vm133_vm3 = vcmask 7168  }
   0x2   :  { %v172_v5 = vpack.c.bf16 %v23_v2, %v22_v1  ;;  %v25_v6 = vld [vmem:[%s264_s1 + $0x18] sm:$0xff]  ;;  %v26_v8 = vld [vmem:[%s264_s1 + $0x20] sm:$0xff]  ;;  %v27_v9 = vld [vmem:[%s264_s1 + $0x28] sm:$0xff] }
   0x3   :  { %v175_v7 = vpack.c.bf16 %v25_v6, %v24_v3  ;;  %v178_v10 = vpack.c.bf16 %v27_v9, %v26_v8  ;;  %v28_v11 = vld [vmem:[%s264_s1 + $0x30] sm:$0xff]  ;;  %v29_v12 = vld [vmem:[%s264_s1 + $0x38] sm:$0xff]  ;;  %v21_v14 = vld [vmem:[%s265_s0] sm:$0xff] }
   0x4   :  { %173 = vmatpush3.bf16.msra.mxu0 %v172_v5  ;;  %v181_v13 = vpack.c.bf16 %v29_v12, %v28_v11  ;;  %v139_v15 = vld [vmem:[%s266_s2] ss:$0 sm:$0xff] }
   0x5   :  { %174 = vmatprep.subr.bf16.mxu0 %v192_v0  ;;  %v141_v19 = vld [vmem:[%s267_s3] ss:$0 sm:$0xff] }
   0x8   :  { %176 = vmatpush3.bf16.msra.mxu0 %v175_v7 }
   0x9   :  { %177 = vmatprep.subr.bf16.mxu0 %v192_v0 }
   0xc   :  { %179 = vmatpush3.bf16.msra.mxu0 %v178_v10 }
   0xd   :  { %180 = vmatprep.subr.bf16.mxu0 %v192_v0 }
  0x10   :  { %182 = vmatpush3.bf16.msra.mxu0 %v181_v13 }
  0x13   :  { %169 = vmatmul.mubr.msk.f32.vlgmr.msra.gmra.mrb[0].mxu0 %vm37_vm1, %v21_v14 }
  0xe6   :  { %v107_v16 = vpop.f32.mrb[0].mxu0 }
  0xe7   :  { %v108_v17 = vadd.f32 %v139_v15, %v107_v16  ;;  %v170_v18 = vpop.f32.mrb[1].mxu0 }
  0xe9   :  { %186 = vtanh.f32 %v108_v17 }
  0xf3   :  { %v187_v20 = vpop.eup %186 }
  0xf4   :  { %v119_v21 = vmul.f32 %v187_v20, %v141_v19 }
  0xf6   :  { %v121_v22 = vsel %vm120_vm2, %v119_v21, 0.0 }
  0xf7   :  { %122 = vadd.xlane.f32.xlu0 %v121_v22 }
 0x184   :  { %v123_v24 = vpop.xlane.xlu0 %122 }
 0x185   :  { %v126_v25 = vadd.f32 %v125_v23, %v123_v24 }
 0x187   :  { %v142_v26 = vmul.f32 -1.442695, %v126_v25 }
 0x189   :  { %188 = vpow2.f32 %v142_v26 }
 0x193   :  { %v189_v27 = vpop.eup %188 }
 0x194   :  { %v130_v28 = vadd.f32 1.0, %v189_v27 }
 0x196   :  { %190 = vrcp.f32 %v130_v28 }
 0x1a0   :  { %v191_v29 = vpop.eup %190 }
 0x1a1   :  { %134 = vst.msk [vmem:[%s269_s5] sm:$0xff] %vm133_vm3, %v191_v29 }

</bundles_post_ra>
